<compile_context>
chip_gen: v7x
topology: tpu7x:2x2x1
jax: 0.10.0
libtpu: 0.0.40
codegen_flags: <defaults>
</compile_context>

<pallas_src>
import jax
import jax.numpy as jnp
from jax.experimental import pallas as pl
from jax.experimental.pallas import tpu as pltpu


def _deconv_mm_kernel(x_ref, w_ref, b_ref, o_ref):
    # x_ref: (1, Ci, thw)   w_ref: (D, Ci)   b_ref: (D, 1)   o_ref: (1, D, thw)
    acc = jnp.dot(w_ref[...], x_ref[0], preferred_element_type=jnp.float32)
    o_ref[0] = (acc + b_ref[...]).astype(o_ref.dtype)


def _pick_hw_tile(hw, ci, d, in_itemsize, out_itemsize,
                  target=1024, vmem_budget=24 << 20):
    """Largest lane tile: multiple of 128, <= target, and small enough that the
    double-buffered input/output tiles plus the resident weight stay under a
    conservative VMEM budget (< v7x's 32 MiB default scoped limit)."""
    if hw <= target:
        return hw                      # full spatial extent is always a legal block
    per_lane = 2 * (ci * in_itemsize + d * out_itemsize)  # double-buffered x & o cols
    budget = vmem_budget - 2 * d * ci * in_itemsize - 2 * d * 4
    cap = max(128, (budget // per_lane) // 128 * 128)
    return int(min(target, cap))


def conv_transpose_2x2_stride2(x1, weight, bias, *, compute_dtype=None):
    """ConvTranspose2d(kernel=2, stride=2) via a Pallas matmul kernel.

    x1:     (N, Ci, H, W)   NCHW
    weight: (Ci, Co, 2, 2)  PyTorch ConvTranspose2d weight layout
    bias:   (Co,)
    compute_dtype: optional dtype (e.g. jnp.bfloat16) for the matmul operands;
        accumulation is always f32 and the output keeps x1.dtype.
    returns (N, Co, 2H, 2W)
    """
    N, Ci, H, W = x1.shape
    Co = weight.shape[1]
    HW = H * W
    D = 4 * Co
    out_dtype = x1.dtype

    # NCHW -> (N, Ci, H*W) is a free reshape (no data movement).
    x_rows = x1.reshape(N, Ci, HW)
    # (Ci, Co, kh, kw) -> (Co, kh, kw, Ci) -> (D, Ci) ; d = co*4 + kh*2 + kw.
    w2t = jnp.transpose(weight, (1, 2, 3, 0)).reshape(D, Ci)
    # bias repeated 4x per output channel, matching the d ordering above.
    b2 = jnp.repeat(bias.astype(jnp.float32), 4).reshape(D, 1)

    if compute_dtype is not None:
        x_rows = x_rows.astype(compute_dtype)
        w2t = w2t.astype(compute_dtype)

    thw = _pick_hw_tile(
        HW, Ci, D,
        in_itemsize=jnp.dtype(x_rows.dtype).itemsize,
        out_itemsize=jnp.dtype(out_dtype).itemsize)
    grid = (N, pl.cdiv(HW, thw))

    cost = pl.CostEstimate(
        flops=2 * N * HW * Ci * D,
        transcendentals=0,
        bytes_accessed=(N * Ci * HW * jnp.dtype(x_rows.dtype).itemsize
                        + D * Ci * jnp.dtype(w2t.dtype).itemsize
                        + D * 4
                        + N * D * HW * jnp.dtype(out_dtype).itemsize))

    y = pl.pallas_call(
        _deconv_mm_kernel,
        out_shape=jax.ShapeDtypeStruct((N, D, HW), out_dtype),
        grid_spec=pltpu.PrefetchScalarGridSpec(
            num_scalar_prefetch=0,
            grid=grid,
            in_specs=[
                pl.BlockSpec((1, Ci, thw), lambda n, t: (n, 0, t)),
                pl.BlockSpec((D, Ci), lambda n, t: (0, 0)),
                pl.BlockSpec((D, 1), lambda n, t: (0, 0)),
            ],
            out_specs=pl.BlockSpec((1, D, thw), lambda n, t: (n, 0, t)),
        ),
        compiler_params=pltpu.CompilerParams(
            dimension_semantics=("parallel", "parallel")),
        cost_estimate=cost,
    )(x_rows, w2t, b2)

    # (N, D, HW) -> (N, Co, kh, kw, H, W) -> (N, Co, H, kh, W, kw) -> (N, Co, 2H, 2W)
    y = y.reshape(N, Co, 2, 2, H, W)
    up = jnp.transpose(y, (0, 1, 4, 2, 5, 3)).reshape(N, Co, 2 * H, 2 * W)
    return up


def copy_crop(x1, x2, weight, bias, *, compute_dtype=None):
    """Forward pass of CopyCrop. x1, x2 are NCHW."""
    up = conv_transpose_2x2_stride2(x1, weight, bias, compute_dtype=compute_dtype)
    crop_row = (x2.shape[2] - up.shape[2]) // 2 - 1
    crop_col = up.shape[2] + crop_row
    if crop_row < 0:
        # TODO(synk): PyTorch negative-index wraparound (x2.H - up.H < 2) not reproduced.
        raise NotImplementedError("copy_crop requires x2.H >= up.H + 2")
    x2_final = x2[:, :, crop_row:crop_col, crop_row:crop_col]
    return jnp.concatenate([x2_final, up], axis=1)


if __name__ == "__main__":
    key = jax.random.PRNGKey(0)
    k1, k2, k3, k4 = jax.random.split(key, 4)

    N, in_ch, out_ch, H = 2, 4, 4, 8          # x1: (2,4,8,8) -> up: (2,4,16,16)
    x1 = jax.random.normal(k1, (N, in_ch, H, H), jnp.float32)
    x2 = jax.random.normal(k2, (N, out_ch, 2 * H + 4, 2 * H + 4), jnp.float32)

    # Deterministic synthetic parameters for nn.ConvTranspose2d(in_ch, out_ch, 2, stride=2)
    weight = jax.random.normal(k3, (in_ch, out_ch, 2, 2), jnp.float32) * 0.1
    bias = jax.random.normal(k4, (out_ch,), jnp.float32) * 0.1

    # Pure-JAX reference for correctness of the Pallas path.
    up_ref = jnp.einsum('nihw,iokl->nohkwl', x1, weight).reshape(
        N, out_ch, 2 * H, 2 * H) + bias[None, :, None, None]
    crop_row = (x2.shape[2] - up_ref.shape[2]) // 2 - 1
    crop_col = up_ref.shape[2] + crop_row
    ref = jnp.concatenate(
        [x2[:, :, crop_row:crop_col, crop_row:crop_col], up_ref], axis=1)

    # f32 path (exact).
    out = jax.block_until_ready(copy_crop(x1, x2, weight, bias))
    assert out.shape == (N, 2 * out_ch, 2 * H, 2 * H), out.shape
    assert jnp.allclose(out, ref, atol=1e-5, rtol=1e-5)

    # bf16 matmul-operand path (recommended on v6e/v7x: halves HBM read traffic;
    # accumulation stays f32, output stays f32).
    out_bf16 = jax.block_until_ready(
        copy_crop(x1, x2, weight, bias, compute_dtype=jnp.bfloat16))
    assert jnp.allclose(out_bf16, ref, atol=5e-2, rtol=5e-2)

    print("KERNEL_OK")
</pallas_src>

<mosaic_0001>
module attributes {stable_mosaic.version = 11 : i64} {
  func.func @_deconv_mm_kernel(%arg0: i32, %arg1: i32, %arg2: memref<1x4x64xf32, #tpu.memory_space<vmem>>, %arg3: memref<16x4xf32, #tpu.memory_space<vmem>>, %arg4: memref<16x1xf32, #tpu.memory_space<vmem>>, %arg5: memref<1x16x64xf32, #tpu.memory_space<vmem>>) attributes {dimension_semantics = [#tpu.dimension_semantics<parallel>, #tpu.dimension_semantics<parallel>], iteration_bounds = array<i64: 2, 1>, scalar_prefetch = 0 : i64, scratch_operands = 0 : i64, tpu.core_type = #tpu.core_type<tc>, window_params = [{transform_indices = @transform_0, window_bounds = array<i64: 1, 4, 64>}, {pipeline_mode = #tpu.pipeline_mode<synchronous>, transform_indices = @transform_1, window_bounds = array<i64: 16, 4>}, {pipeline_mode = #tpu.pipeline_mode<synchronous>, transform_indices = @transform_2, window_bounds = array<i64: 16, 1>}, {transform_indices = @transform_3, window_bounds = array<i64: 1, 16, 64>}]} {
    %c0 = arith.constant 0 : index
    %c0_0 = arith.constant 0 : index
    %0 = vector.load %arg3[%c0, %c0_0] : memref<16x4xf32, #tpu.memory_space<vmem>>, vector<16x4xf32>
    %c0_1 = arith.constant 0 : index
    %c0_2 = arith.constant 0 : index
    %c0_3 = arith.constant 0 : index
    %1 = vector.load %arg2[%c0_1, %c0_2, %c0_3] : memref<1x4x64xf32, #tpu.memory_space<vmem>>, vector<1x4x64xf32>
    %2 = vector.shape_cast %1 : vector<1x4x64xf32> to vector<4x64xf32>
    %cst = arith.constant dense<0.000000e+00> : vector<16x64xf32>
    %3 = tpu.matmul %0, %2, %cst {dimension_numbers = #tpu.dot_dimension_numbers<[1], [0], [0], [1], [0, 0, 1, 1], [], []>} : vector<16x4xf32>, vector<4x64xf32>, vector<16x64xf32> -> vector<16x64xf32>
    %c0_4 = arith.constant 0 : index
    %c0_5 = arith.constant 0 : index
    %4 = vector.load %arg4[%c0_4, %c0_5] : memref<16x1xf32, #tpu.memory_space<vmem>>, vector<16x1xf32>
    %5 = vector.broadcast %4 : vector<16x1xf32> to vector<16x64xf32>
    %6 = arith.addf %3, %5 : vector<16x64xf32>
    %c0_6 = arith.constant 0 : index
    %c0_7 = arith.constant 0 : index
    %c0_8 = arith.constant 0 : index
    %7 = vector.load %arg5[%c0_6, %c0_7, %c0_8] : memref<1x16x64xf32, #tpu.memory_space<vmem>>, vector<1x16x64xf32>
    %8 = vector.shape_cast %7 : vector<1x16x64xf32> to vector<16x64xf32>
    %9 = vector.shape_cast %6 : vector<16x64xf32> to vector<1x16x64xf32>
    tpu.vector_store %arg5[%c0_6, %c0_7, %c0_8], %9 {strides = array<i32>} : memref<1x16x64xf32, #tpu.memory_space<vmem>>, vector<1x16x64xf32>,
    return
  }
  func.func @transform_0(%arg0: i32, %arg1: i32) -> (i32, i32, i32) {
    %c0_i32 = arith.constant 0 : i32
    %c0_i32_0 = arith.constant 0 : i32
    return %arg0, %c0_i32, %arg1 : i32, i32, i32
  }
  func.func @transform_1(%arg0: i32, %arg1: i32) -> (i32, i32) {
    %c0_i32 = arith.constant 0 : i32
    %c0_i32_0 = arith.constant 0 : i32
    %c0_i32_1 = arith.constant 0 : i32
    return %c0_i32, %c0_i32_0 : i32, i32
  }
  func.func @transform_2(%arg0: i32, %arg1: i32) -> (i32, i32) {
    %c0_i32 = arith.constant 0 : i32
    %c0_i32_0 = arith.constant 0 : i32
    %c0_i32_1 = arith.constant 0 : i32
    return %c0_i32, %c0_i32_0 : i32, i32
  }
  func.func @transform_3(%arg0: i32, %arg1: i32) -> (i32, i32, i32) {
    %c0_i32 = arith.constant 0 : i32
    %c0_i32_0 = arith.constant 0 : i32
    return %arg0, %c0_i32, %arg1 : i32, i32, i32
  }
}

</mosaic_0001>

<bundles_post_ra>
// kernel: tpu_custom_call.1
= control target key start
LH: loop header
LB: loop body
LE: loop exit
PB: predicated region body
PF: predicated region fallthrough
CT: control target
= control target key end

     0   :  { %8 = vsyncpa [#allocation3], 0  ;;  %s701_s0 = inlined_call_operand.vmem [shape: f32[2,4,64], index: 0, kind: input, shape index: {}]   ;;  %s702_s1 = inlined_call_operand.vmem [shape: f32[16,4], index: 1, kind: input, shape index: {}]   ;;  %s703_s2 = inlined_call_operand.vmem [shape: f32[16,1], index: 2, kind: input, shape index: {}]   ;;  %s704_s3 = inlined_call_operand.hbm [shape: f32[2,16,64], index: 3, kind: output, shape index: {}]  }
   0x1   :  { %10 = vsyncpa [#allocation3 + $0x1], 0  ;;  %s572_s12 = smov 0   ;;  %s574_s13 = smov 0  }
   0x2   :  { %s576_s14 = smov 0   ;;  %s578_s15 = smov 0  }
   0x3   :  { %s580_s16 = smov 0   ;;  %s582_s17 = smov 0  }
   0x4 LB: > { %s385_s18 = sadd.s32 4294967295, %s546_s17   ;;  %s386_s19 = sadd.s32 4294967294, %s546_s17   ;;  %s546_s17 = sphi %s582_s17, %s16_s17   ;;  %s542_s16 = sphi %s580_s16, %s711_s16   ;;  %s538_s15 = sphi %s578_s15, %s710_s15   ;;  %s534_s14 = sphi %s576_s14, %s709_s14   ;;  %s530_s13 = sphi %s574_s13, %s708_s13   ;;  %s526_s12 = sphi %s572_s12, %s707_s12  }
   0x5   : > { %s28_s20 = sadd.s32 1, %s542_s16  ;;  %s107_s21 = sadd.s32 1, %s534_s14 }
   0x6   : > { %p30_p0 = scmp.ge.s32.totalorder %s28_s20, 2  ;;  %p117_p1 = scmp.ne.s32.totalorder %s534_s14, %s530_s13 }
   0x7   : > { %p118_p2 = scmp.eq.s32.totalorder %s385_s18, 1  ;;  %p123_p3 = scmp.ne.s32.totalorder %s530_s13, %s526_s12 }
   0x8   : > { %s713_s20 = smov (%p30_p0, %s28_s20), 0  ;;  %p124_p5 = scmp.eq.s32.totalorder %s386_s19, 1 }
   0x9   : > { %p612_p4 = por %p118_p2, %p117_p1  ;;  %s102_s23 = ssub.s32 %s542_s16, %s713_s20 }
   0xa   : > { %p389_p6 = scmp.ge.s32.totalorder %s546_s17, 1  ;;  %p105_p7 = scmp.eq.s32.totalorder %s102_s23, 0 }
   0xb   : > { %p619_p8 = por %p124_p5, %p123_p3  ;;  %p158_p9 = scmp.lt.s32.totalorder %s546_s17, 3 }
   0xc   : > { %s625_s25 = scalar_select %p105_p7, %s534_s14, %s107_s21  }
   0xd   : > { %p159_p10 = pnand %p389_p6, %p158_p9 }
   0xe   : > { %p184_p11 = scmp.lt.s32.totalorder (!%p159_p10), %s538_s15, 1  ;;  %v191_v0 = vld [vmem:[%s702_s1] sm:$0xff] (!%p159_p10)  ;;  %vm206_vm0 = vcmask (!%p159_p10), 31744   ;;  %v548_v1 = vmov (!%p159_p10), 0   ;;  %v195_v3 = vld [vmem:[%s703_s2 + $0x8] sm:$0xff] (!%p159_p10)  ;;  %vm213_vm1 = vcmask (!%p159_p10), 1043456  }
   0xf   : > { %162 = sbr.rel (%p159_p10) target bundleno = 259 (0x103), region = 32  ;;  %406 = vmatprep.mubr.msk.f32.mxu0 (!%p159_p10), %vm206_vm0, %v191_v0  ;;  %467 = vset.pattern.permute.xlu0 (!%p159_p10), %v548_v1  ;;  %v194_v2 = vld [vmem:[%s703_s2] sm:$0xff] (!%p159_p10)  ;;  %v192_v5 = vld [vmem:[%s702_s1 + $0x8] sm:$0xff] (!%p159_p10)  ;;  %s181_s18 = sand.u32 (!%p159_p10), 1, %s530_s13   ;;  %vm292_vm2 = vcmask (!%p159_p10), 523264  }
  0x10   : > { %198 = vperm.xlu0 (!%p159_p10), %467, %v194_v2   ;;  %s390_s19 = sshll.u32 (!%p159_p10), %s181_s18, 4  ;;  %s400_s26 = sshll.u32 (!%p159_p10), %s538_s15, 8 }
  0x11   : > { %s183_s21 = scalar_lea.vmem (!%p159_p10), [#allocation2], %s390_s19  ;;  %s653_s29 = scalar_lea.hbm (!%p159_p10), %s704_s3, %s400_s26 }
  0x12   : > { %s310_s23 = sshll.u32 (!%p159_p10), %s183_s21, 4  ;;  %s549_s4 = smov (!%p159_p10), [#allocation2]   ;;  %s648_s23 = int_to_ptr.vmem [resolvable:$true] %s310_s23 }
  0x13   : > { %s472_s5 = sshll.u32 (!%p159_p10), %s549_s4, 4  ;;  %s473_s5 = int_to_ptr.vmem [resolvable:$false] %s472_s5 }
  0x14   : > { %203 = vperm.xlu0 (!%p159_p10), %467, %v195_v3   ;;  %p475_p1 = scmp.lt.s32.totalorder (!%p159_p10), %s648_s23, %s473_s5 }
  0x16   : > { %s185_s30 = scalar_select %p184_p11, %s538_s15, 1 }
  0x17   : > { %s468_s15 = scalar_lea.vmem %s648_s23, 256 }
  0x18   : > { %s391_s6 = sshll.u32 %s185_s30, 2  ;;  %s655_s30 = scalar_lea.sflag [#allocation3], %s181_s18 }
  0x19   : > { %s190_s9 = scalar_lea.vmem %s701_s0, %s391_s6  ;;  %p469_p12 = scmp.ne.s32.totalorder %s648_s23, %s468_s15 }
  0x1a   : > { %v193_v4 = vld [vmem:[%s190_s9] sm:$0xf]  ;;  %s474_s6 = scalar_lea.vmem %s473_s5, 512 }
  0x1b   : > { %404 = vmatprep.subr.msk.mxu0 %vm213_vm1, %v193_v4  ;;  %p470_p13 = pnand %p469_p12, %p612_p4  ;;  %p476_p2 = scmp.lt.s32.totalorder %s474_s6, %s468_s15 }
  0x1c   : > { %405 = vmatpush3.msk.msra.mxu0 %vm213_vm1, %v193_v4 }
  0x1d   : > { %407 = vmatmul.mubr.msk.f32.vlgmr.msra.gmra.mrb[0].mxu0 %vm206_vm0, %v192_v5  ;;  %p471_p0 = pneg %p470_p13  ;;  %p477_p3 = por %p476_p2, %p475_p1 }
  0x1f   : > { %p478_p5 = pnand %p477_p3, %p471_p0 }
  0x8f   : > { %v199_v6 = vpop.permute.xlu0 %198 }
  0x93   : > { %v204_v7 = vpop.permute.xlu0 %203 }
  0xf0   : > { %v408_v8 = vpop.f32.mrb[0].mxu0 }
  0xf1   : > { %v289_v9 = vadd.f32 %v408_v8, %v204_v7  ;;  %v283_v10 = vpop.f32.mrb[1].mxu0 }
  0xf2   : > { %v284_v11 = vadd.f32 %v283_v10, %v199_v6 }
  0xf3   : > { %294 = vst.msk [vmem:[%s183_s21 + $0x8] sm:$0xff] %vm292_vm2, %v289_v9 }
  0xf4   : > { %293 = vst.msk [vmem:[%s183_s21] sm:$0xff] %vm292_vm2, %v284_v11 }
  0xf5   : > { %481 = shalt.err (!%p478_p5)
}
  0xf6   : > { %s482_s7 = scalar_lea.hbm %s653_s29, 256  ;;  %s486_s10 = scalar_lea.hbm %s704_s3, 512 }
  0xf7   : > { %p483_p6 = scmp.ne.s32.totalorder %s653_s29, %s482_s7  ;;  %p487_p10 = scmp.lt.u32.totalorder %s653_s29, %s704_s3 }
  0xf8   : > { %p488_p11 = scmp.lt.u32.totalorder %s486_s10, %s482_s7  ;;  %p490_p13 = scmp.lt.u32.totalorder %s482_s7, %s653_s29 }
  0xf9   : > { %p484_p7 = pnand %p483_p6, %p612_p4 }
  0xfa   : > { %p489_p12 = por %p488_p11, %p487_p10 }
  0xfb   : > { %p485_p9 = pneg %p484_p7 }
  0xfc   : > { %p491_p0 = por %p490_p13, %p489_p12 }
  0xfe   : > { %p492_p1 = pnand %p491_p0, %p485_p9 }
 0x100   : > { %495 = shalt.err (!%p492_p1)
}
 0x101   : > { %s550_s19 = smov 128   ;;  %s551_s21 = smov 8  }
 0x102   : > { %409 = dma.vmem_to_hbm [thread:$0]  (%p612_p4), %s648_s23, 256, %s653_s29, %s655_s30, %s550_s19, %s550_s19, %s551_s21  }
 0x103 PF: > { %p415_p2 = scmp.ge.s32.totalorder %s546_s17, 2  ;;  %s325_s26 = sand.u32 1, %s526_s12  }
 0x104   : > { %s326_s27 = scalar_lea.sflag [#allocation3], %s325_s26 }
 0x105   : > { %p412_p3 = pnand %p415_p2, %p619_p8 }
 0x107   : > { %521 = dma.done.wait (!%p412_p3), %s326_s27, 256  }
 0x108   : > { %523 = vsyncadd (!%p412_p3), %s326_s27, 4294967040  ;;  %s16_s17 = sadd.s32 1, %s546_s17   ;;  %s707_s12 = smov %s530_s13 }
 0x109   : > { %p13_p5 = scmp.ge.s32.totalorder %s16_s17, 4   ;;  %s708_s13 = smov %s534_s14 }
 0x10a   : > { %s709_s14 = smov %s625_s25  ;;  %s710_s15 = smov %s542_s16 }
 0x10b   : > { %s711_s16 = smov %s713_s20  ;;  %15 = sbr.rel (!%p13_p5) target bundleno = 4 (0x4), region = 67 }
 0x112   :  { %331 = vsyncpa [#allocation3], 1 }
 0x113   :  { %333 = vsyncpa [#allocation3 + $0x1], 1 }

</bundles_post_ra>
